<compile_context>
chip_gen: v7x
topology: tpu7x:2x2x1
jax: 0.10.0
libtpu: 0.0.40
codegen_flags: <defaults>
</compile_context>

<pallas_src>
import jax
import jax.numpy as jnp
from jax.experimental import pallas as pl
from jax.experimental.pallas import tpu as pltpu


def _classic_attention_kernel(x_ref, w_ref, b_ref, v_ref, out_ref):
    # x_ref:   (Bb, T, D_in) VMEM
    # w_ref:   (E, D_in)     VMEM   (replicated Linear weight)
    # b_ref:   (1, E)        VMEM   (replicated Linear bias)
    # v_ref:   (1, E)        VMEM   (replicated attention vector)
    # out_ref: (Bb, T)       VMEM
    x = x_ref[...]                                         # (Bb, T, D_in) f32
    w = w_ref[...]                                         # (E, D_in)
    b = b_ref[...]                                         # (1, E)
    vv = v_ref[...]                                        # (1, E)

    # Fused projection vector and bias scalar (exact up to f32 summation order):
    #   wv = v @ W  -> (1, D_in)   (MXU; the MXU is otherwise idle here)
    #   bv = <b, v> -> (1, 1)
    wv = jnp.dot(vv, w, preferred_element_type=jnp.float32)     # (1, D_in)
    bv = jnp.sum(vv * b, axis=-1, keepdims=True)                # (1, 1)

    # Matvec over D_in on the VPU + lane reduce, then tanh on the EUP.
    scores = jnp.sum(x * wv[None, :, :], axis=-1) + bv          # (Bb, T)
    scores = jnp.tanh(scores)

    # Row softmax over the sequence axis (PyTorch softmax(dim=1) of (B, T)).
    m = jnp.max(scores, axis=-1, keepdims=True)
    e = jnp.exp(scores - m)
    denom = jnp.sum(e, axis=-1, keepdims=True)                  # (Bb, 1)
    inv = pl.reciprocal(denom, approx=True)                     # EUP vrcp
    inv = inv * (2.0 - denom * inv)                             # one Newton step
    out_ref[...] = e * inv


def classic_attention(inputs, weight, bias, v, *, block_b=8):
    """Pallas forward of Classic_Attention.

    inputs: (B, T, D_in) f32; weight: (E, D_in); bias: (E,); v: (E,) -> (B, T) f32
    """
    B, T, D_in = inputs.shape
    E = weight.shape[0]
    f32 = jnp.float32

    x = inputs.astype(f32)
    w = weight.astype(f32)
    b2 = bias.astype(f32).reshape(1, E)    # free-ish reshape (same minor dim)
    v2 = v.astype(f32).reshape(1, E)

    # Batch blocking: Bb rows per grid step. Pad the batch only if it does not
    # divide evenly (padded rows produce finite garbage and are sliced off).
    Bb = max(1, min(block_b, B))
    B_pad = pl.cdiv(B, Bb) * Bb
    if B_pad != B:
        x = jnp.pad(x, ((0, B_pad - B), (0, 0), (0, 0)))

    out = pl.pallas_call(
        _classic_attention_kernel,
        out_shape=jax.ShapeDtypeStruct((B_pad, T), f32),
        grid_spec=pltpu.PrefetchScalarGridSpec(
            num_scalar_prefetch=0,
            grid=(B_pad // Bb,),
            in_specs=[
                pl.BlockSpec((Bb, T, D_in), lambda i: (i, 0, 0)),
                pl.BlockSpec((E, D_in), lambda i: (0, 0)),   # replicated W
                pl.BlockSpec((1, E), lambda i: (0, 0)),      # replicated b
                pl.BlockSpec((1, E), lambda i: (0, 0)),      # replicated v
            ],
            out_specs=pl.BlockSpec((Bb, T), lambda i: (i, 0)),
        ),
        compiler_params=pltpu.CompilerParams(
            # Batch grid axis is embarrassingly parallel -> v7x's 2 TCs split it;
            # harmless on single-TC v5e/v6e.
            dimension_semantics=("parallel",),
        ),
    )(x, w, b2, v2)

    return out[:B] if B_pad != B else out


def classic_attention_ref(inputs, weight, bias, v):
    lin = jnp.einsum("btd,ed->bte", inputs, weight) + bias      # (B, T, E)
    scores = jnp.tanh(jnp.einsum("bte,e->bt", lin, v))          # (B, T)
    return jax.nn.softmax(scores, axis=1)


if __name__ == "__main__":
    # Small shapes consistent with the module; B=16 so the batch-blocked grid
    # has 2 parallel steps of Bb=8 rows each.
    B, T, D_in, E = 16, 8, 32, 16

    key = jax.random.PRNGKey(0)
    kx, kw, kb, kv = jax.random.split(key, 4)

    x = jax.random.normal(kx, (B, T, D_in), dtype=jnp.float32)
    weight = jax.random.normal(kw, (E, D_in), dtype=jnp.float32) * (1.0 / jnp.sqrt(D_in))
    bias = jax.random.normal(kb, (E,), dtype=jnp.float32) * 0.1
    v = jax.random.normal(kv, (E,), dtype=jnp.float32)

    out = classic_attention(x, weight, bias, v)
    out = jax.block_until_ready(out)

    ref = classic_attention_ref(x, weight, bias, v)
    assert out.shape == (B, T), out.shape
    assert jnp.allclose(out, ref, atol=1e-5, rtol=1e-5), (out, ref)

    print("KERNEL_OK")
</pallas_src>

<mosaic_0001>
module attributes {stable_mosaic.version = 11 : i64} {
  func.func @_classic_attention_kernel(%arg0: i32, %arg1: memref<8x8x32xf32, #tpu.memory_space<vmem>>, %arg2: memref<16x32xf32, #tpu.memory_space<vmem>>, %arg3: memref<1x16xf32, #tpu.memory_space<vmem>>, %arg4: memref<1x16xf32, #tpu.memory_space<vmem>>, %arg5: memref<8x8xf32, #tpu.memory_space<vmem>>) attributes {dimension_semantics = [#tpu.dimension_semantics<parallel>], iteration_bounds = array<i64: 2>, scalar_prefetch = 0 : i64, scratch_operands = 0 : i64, tpu.core_type = #tpu.core_type<tc>, window_params = [{transform_indices = @transform_0, window_bounds = array<i64: 8, 8, 32>}, {pipeline_mode = #tpu.pipeline_mode<synchronous>, transform_indices = @transform_1, window_bounds = array<i64: 16, 32>}, {pipeline_mode = #tpu.pipeline_mode<synchronous>, transform_indices = @transform_2, window_bounds = array<i64: 1, 16>}, {pipeline_mode = #tpu.pipeline_mode<synchronous>, transform_indices = @transform_3, window_bounds = array<i64: 1, 16>}, {transform_indices = @transform_4, window_bounds = array<i64: 8, 8>}]} {
    %c0 = arith.constant 0 : index
    %c0_0 = arith.constant 0 : index
    %c0_1 = arith.constant 0 : index
    %0 = vector.load %arg1[%c0, %c0_0, %c0_1] : memref<8x8x32xf32, #tpu.memory_space<vmem>>, vector<8x8x32xf32>
    %c0_2 = arith.constant 0 : index
    %c0_3 = arith.constant 0 : index
    %1 = vector.load %arg2[%c0_2, %c0_3] : memref<16x32xf32, #tpu.memory_space<vmem>>, vector<16x32xf32>
    %c0_4 = arith.constant 0 : index
    %c0_5 = arith.constant 0 : index
    %2 = vector.load %arg3[%c0_4, %c0_5] : memref<1x16xf32, #tpu.memory_space<vmem>>, vector<1x16xf32>
    %c0_6 = arith.constant 0 : index
    %c0_7 = arith.constant 0 : index
    %3 = vector.load %arg4[%c0_6, %c0_7] : memref<1x16xf32, #tpu.memory_space<vmem>>, vector<1x16xf32>
    %cst = arith.constant dense<0.000000e+00> : vector<1x32xf32>
    %4 = tpu.matmul %3, %1, %cst {dimension_numbers = #tpu.dot_dimension_numbers<[1], [0], [0], [1], [0, 0, 1, 1], [], []>} : vector<1x16xf32>, vector<16x32xf32>, vector<1x32xf32> -> vector<1x32xf32>
    %5 = arith.mulf %3, %2 : vector<1x16xf32>
    %cst_8 = arith.constant dense<0.000000e+00> : vector<1xf32>
    %6 = vector.multi_reduction <add>, %5, %cst_8 [1] : vector<1x16xf32> to vector<1xf32>
    %7 = vector.shape_cast %6 : vector<1xf32> to vector<1x1xf32>
    %8 = vector.shape_cast %4 : vector<1x32xf32> to vector<1x1x32xf32>
    %9 = vector.broadcast %8 : vector<1x1x32xf32> to vector<8x8x32xf32>
    %10 = arith.mulf %0, %9 : vector<8x8x32xf32>
    %cst_9 = arith.constant dense<0.000000e+00> : vector<8x8xf32>
    %11 = vector.multi_reduction <add>, %10, %cst_9 [2] : vector<8x8x32xf32> to vector<8x8xf32>
    %12 = vector.broadcast %7 : vector<1x1xf32> to vector<8x8xf32>
    %13 = arith.addf %11, %12 : vector<8x8xf32>
    %14 = math.tanh %13 : vector<8x8xf32>
    %cst_10 = arith.constant dense<0xFF800000> : vector<8xf32>
    %15 = vector.multi_reduction <maximumf>, %14, %cst_10 [1] : vector<8x8xf32> to vector<8xf32>
    %16 = vector.shape_cast %15 : vector<8xf32> to vector<8x1xf32>
    %17 = vector.broadcast %16 : vector<8x1xf32> to vector<8x8xf32>
    %18 = arith.subf %14, %17 : vector<8x8xf32>
    %19 = math.exp %18 : vector<8x8xf32>
    %cst_11 = arith.constant dense<0.000000e+00> : vector<8xf32>
    %20 = vector.multi_reduction <add>, %19, %cst_11 [1] : vector<8x8xf32> to vector<8xf32>
    %21 = vector.shape_cast %20 : vector<8xf32> to vector<8x1xf32>
    %22 = tpu.reciprocal %21 {approx = true} : vector<8x1xf32> -> vector<8x1xf32>
    %23 = arith.mulf %21, %22 : vector<8x1xf32>
    %cst_12 = arith.constant 2.000000e+00 : f32
    %24 = vector.broadcast %cst_12 : f32 to vector<8x1xf32>
    %25 = arith.subf %24, %23 : vector<8x1xf32>
    %26 = arith.mulf %22, %25 : vector<8x1xf32>
    %27 = vector.broadcast %26 : vector<8x1xf32> to vector<8x8xf32>
    %28 = arith.mulf %19, %27 : vector<8x8xf32>
    %c0_13 = arith.constant 0 : index
    %c0_14 = arith.constant 0 : index
    %29 = vector.load %arg5[%c0_13, %c0_14] : memref<8x8xf32, #tpu.memory_space<vmem>>, vector<8x8xf32>
    tpu.vector_store %arg5[%c0_13, %c0_14], %28 {strides = array<i32>} : memref<8x8xf32, #tpu.memory_space<vmem>>, vector<8x8xf32>,
    return
  }
  func.func @transform_0(%arg0: i32) -> (i32, i32, i32) {
    %c0_i32 = arith.constant 0 : i32
    %c0_i32_0 = arith.constant 0 : i32
    %c0_i32_1 = arith.constant 0 : i32
    return %arg0, %c0_i32, %c0_i32_0 : i32, i32, i32
  }
  func.func @transform_1(%arg0: i32) -> (i32, i32) {
    %c0_i32 = arith.constant 0 : i32
    %c0_i32_0 = arith.constant 0 : i32
    %c0_i32_1 = arith.constant 0 : i32
    return %c0_i32, %c0_i32_0 : i32, i32
  }
  func.func @transform_2(%arg0: i32) -> (i32, i32) {
    %c0_i32 = arith.constant 0 : i32
    %c0_i32_0 = arith.constant 0 : i32
    %c0_i32_1 = arith.constant 0 : i32
    return %c0_i32, %c0_i32_0 : i32, i32
  }
  func.func @transform_3(%arg0: i32) -> (i32, i32) {
    %c0_i32 = arith.constant 0 : i32
    %c0_i32_0 = arith.constant 0 : i32
    %c0_i32_1 = arith.constant 0 : i32
    return %c0_i32, %c0_i32_0 : i32, i32
  }
  func.func @transform_4(%arg0: i32) -> (i32, i32) {
    %c0_i32 = arith.constant 0 : i32
    %c0_i32_0 = arith.constant 0 : i32
    return %arg0, %c0_i32 : i32, i32
  }
}

</mosaic_0001>

<bundles_post_ra>
// kernel: tpu_custom_call.1
= control target key start
LH: loop header
LB: loop body
LE: loop exit
PB: predicated region body
PF: predicated region fallthrough
CT: control target
= control target key end

     0   :  { %9 = vsyncpa [#allocation3], 0  ;;  %s1300_s0 = inlined_call_operand.hbm [shape: f32[16,8,32], index: 0, kind: input, shape index: {}]   ;;  %s1301_s1 = inlined_call_operand.hbm [shape: f32[16,32], index: 1, kind: input, shape index: {}]   ;;  %s1302_s2 = inlined_call_operand.vmem [shape: f32[1,16], index: 2, kind: input, shape index: {}]   ;;  %s1303_s3 = inlined_call_operand.vmem [shape: f32[1,16], index: 3, kind: input, shape index: {}]   ;;  %s1304_s4 = inlined_call_operand.vmem [shape: f32[16,8], index: 4, kind: output, shape index: {}]  }
   0x1   :  { %11 = vsyncpa [#allocation3 + $0x1], 0 }
   0x2   :  { %12 = vsyncpa [#allocation5], 0  ;;  %s1033_s15 = smov 0   ;;  %s1035_s16 = smov 0  }
   0x3   :  { %s1037_s17 = smov 0   ;;  %s1039_s18 = smov 0  }
   0x4 LB: > { %s1052_s19 = sadd.s32 4294967295, %s998_s18   ;;  %p38_p0 = scmp.ne.s32.totalorder %s990_s16, %s986_s15  ;;  %s998_s18 = sphi %s1039_s18, %s1319_s18   ;;  %s994_s17 = sphi %s1037_s17, %s1318_s17   ;;  %s990_s16 = sphi %s1035_s16, %s1317_s16   ;;  %s986_s15 = sphi %s1033_s15, %s1316_s15  }
   0x5   : > { %p1305_p1 = scmp.eq.s32.totalorder %s1052_s19, 0  ;;  %p783_p2 = scmp.ge.s32.totalorder %s998_s18, 1 }
   0x6   : > { %p138_p3 = scmp.lt.s32.totalorder %s998_s18, 3  ;;  %s1000_s22 = smov [#allocation4]  }
   0x7   : > { %p1060_p4 = por %p1305_p1, %p38_p0  ;;  %s150_s23 = sshll.u32 %s1000_s22, 4  ;;  %s151_s23 = int_to_ptr.vmem [resolvable:$true] %s150_s23 }
   0x8   : > { %p1064_p5 = pnand %p783_p2, %p138_p3  ;;  %s1077_s25 = sadd.s32 1, %s998_s18  }
   0x9   : > { %s1308_s20 = scalar_select %p1060_p4, 1, 0 }
   0xa   : > { %s1309_s21 = scalar_select %p1064_p5, 1, 0 }
   0xb   : > { %p816_p6 = pneg %p1064_p5  ;;  %s25_s26 = sadd.s32 1, %s994_s17 }
   0xc   : > { %s22_s27 = ssub.s32 %s998_s18, %s1077_s25  ;;  %s902_s30 = scalar_lea.hbm %s1301_s1, 256 }
   0xd   : > { %p1072_p7 = pnand %p816_p6, %p1305_p1  ;;  %p903_p8 = scmp.ne.s32.totalorder %s1301_s1, %s902_s30 }
   0xe   : > { %p909_p12 = scmp.lt.u32.totalorder %s902_s30, %s1301_s1 }
   0xf   : > { %p904_p9 = pneg %p1072_p7 }
  0x11   : > { %p905_p10 = pnand %p904_p9, %p903_p8 }
  0x13   : > { %p906_p11 = pneg %p905_p10 }
  0x15   : > { %p911_p13 = pnand %p909_p12, %p906_p11 }
  0x17   : > { %914 = shalt.err (!%p911_p13)
}
  0x18   : > { %s915_s9 = scalar_lea.vmem %s151_s23, 256  ;;  %p923_p6 = scmp.lt.s32.totalorder %s151_s23, %s151_s23 }
  0x19   : > { %p916_p0 = scmp.ne.s32.totalorder %s151_s23, %s915_s9  ;;  %p924_p1 = scmp.lt.s32.totalorder %s915_s9, %s915_s9 }
  0x1b   : > { %p918_p2 = pnand %p916_p0, %p904_p9  ;;  %p925_p4 = por %p924_p1, %p923_p6 }
  0x1d   : > { %p919_p3 = pneg %p918_p2 }
  0x1f   : > { %p926_p5 = pnand %p925_p4, %p919_p3 }
  0x21   : > { %929 = shalt.err (!%p926_p5)
}
  0x22   : > { %s1001_s10 = smov 128   ;;  %s1002_s11 = smov 8  }
  0x23   : > { %819 = dma.hbm_to_vmem [thread:$0]  (!%p1072_p7), %s1301_s1, 256, %s151_s23, [#allocation5], %s1001_s10, %s1001_s10, %s1002_s11  }
  0x24   : > { %p23_p1 = scmp.eq.s32.totalorder %s22_s27, 0  ;;  %p32_p4 = scmp.ne.s32.totalorder %s994_s17, %s990_s16 }
  0x25   : > { %p33_p5 = scmp.eq.s32.totalorder %s998_s18, 0  ;;  %p825_p8 = scmp.lt.s32.totalorder %s998_s18, 2 }
  0x26   : > { %s1106_s14 = scalar_select %p23_p1, %s994_s17, %s25_s26  }
  0x27   : > { %p34_p9 = por %p33_p5, %p32_p4  ;;  %s170_s15 = sand.u32 1, %s994_s17  }
  0x28   : > { %s786_s22 = sshll.u32 %s170_s15, 6  ;;  %s796_s28 = sshll.u32 %s998_s18, 10 }
  0x29   : > { %s1113_s24 = scalar_lea.hbm %s1300_s0, %s796_s28  ;;  %s174_s23 = scalar_lea.vmem [#allocation2], %s786_s22 }
  0x2a   : > { %s181_s27 = sshll.u32 %s174_s23, 4  ;;  %p1117_p7 = pnand %p825_p8, %p34_p9  ;;  %s1115_s27 = int_to_ptr.vmem [resolvable:$true] %s181_s27 }
  0x2b   : > { %s1121_s18 = scalar_lea.sflag [#allocation3], %s170_s15  ;;  %s930_s5 = scalar_lea.hbm %s1113_s24, 1024 }
  0x2c   : > { %p931_p10 = scmp.ne.s32.totalorder %s1113_s24, %s930_s5  ;;  %p932_p11 = pneg %p1117_p7 }
  0x2d   : > { %s935_s8 = scalar_lea.hbm %s1300_s0, 2048  ;;  %p936_p0 = scmp.lt.u32.totalorder %s1113_s24, %s1300_s0 }
  0x2e   : > { %p933_p12 = pnand %p932_p11, %p931_p10  ;;  %p937_p2 = scmp.lt.u32.totalorder %s935_s8, %s930_s5 }
  0x2f   : > { %p939_p6 = scmp.lt.u32.totalorder %s930_s5, %s1113_s24 }
  0x30   : > { %p934_p13 = pneg %p933_p12  ;;  %p938_p3 = por %p937_p2, %p936_p0 }
  0x32   : > { %p940_p1 = por %p939_p6, %p938_p3 }
  0x34   : > { %p941_p4 = pnand %p940_p1, %p934_p13 }
  0x36   : > { %944 = shalt.err (!%p941_p4)
}
  0x37   : > { %s945_s13 = scalar_lea.vmem %s1115_s27, 1024  ;;  %s1003_s15 = smov [#allocation2]  }
  0x38   : > { %p946_p5 = scmp.ne.s32.totalorder %s1115_s27, %s945_s13  ;;  %s950_s22 = sshll.u32 %s1003_s15, 4  ;;  %s951_s22 = int_to_ptr.vmem [resolvable:$false] %s950_s22 }
  0x39   : > { %s952_s28 = scalar_lea.vmem %s951_s22, 2048  ;;  %p953_p10 = scmp.lt.s32.totalorder %s1115_s27, %s951_s22 }
  0x3a   : > { %p948_p8 = pnand %p946_p5, %p932_p11  ;;  %p954_p12 = scmp.lt.s32.totalorder %s952_s28, %s945_s13 }
  0x3c   : > { %p949_p9 = pneg %p948_p8  ;;  %p955_p0 = por %p954_p12, %p953_p10 }
  0x3e   : > { %p956_p2 = pnand %p955_p0, %p949_p9 }
  0x40   : > { %959 = shalt.err (!%p956_p2)
}
  0x41   : > { %823 = dma.hbm_to_vmem [thread:$0]  (!%p1117_p7), %s1113_s24, 1024, %s1115_s27, %s1121_s18, %s1001_s10, %s1001_s10, %s1002_s11  }
  0x42   : > { %p1312_p11 = scmp.ne.s32.totalorder %s1309_s21, 0 }
  0x43   : > { %s195_s29 = sand.u32 (!%p1312_p11), 1, %s990_s16   ;;  %p1313_p13 = scmp.ne.s32.totalorder (!%p1312_p11), %s1308_s20, 0 }
  0x44   : > { %193 = sbr.rel (%p1312_p11) target bundleno = 1113 (0x459), region = 36  ;;  %s790_s30 = sshll.u32 (!%p1312_p11), %s195_s29, 6 }
  0x45   : > { %s196_s23 = scalar_lea.sflag (!%p1312_p11), [#allocation3], %s195_s29  ;;  %s1155_s5 = scalar_lea.vmem (!%p1312_p11), [#allocation2], %s790_s30 }
  0x4b   : > { %977 = dma.done.wait (%p1313_p13), %s196_s23, 1024  }
  0x4c   : > { %979 = vsyncadd (%p1313_p13), %s196_s23, 4294966272  ;;  %p1314_p3 = scmp.eq.s32.totalorder %s1052_s19, 0 }
  0x4e   : > { %981 = dma.done.wait (%p1314_p3), [#allocation5], 256   ;;  %p1315_p7 = pmov %p1314_p3 }
  0x4f   : > { %v1004_v0 = vmov 0.0|0.0   ;;  %vm1005_vm0 = vmmov 0   ;;  %v1006_v1 = vmov 0.0   ;;  %v240_v2 = vld [vmem:[#allocation4] sm:$0xff]  ;;  %v241_v3 = vld [vmem:[#allocation4 + $0x8] sm:$0xff]  ;;  %vm244_vm1 = vcmask 130048  }
  0x50   : > { %983 = vsyncadd (%p1315_p7), [#allocation5], 4294967040  ;;  %807 = vmatprep.subr.bf16.mxu0 %v1004_v0  ;;  %804 = vmatprep.mubr.msk.f32.mxu0 %vm1005_vm0, %v1006_v1  ;;  %v808_v4 = vpack.c.bf16 %v241_v3, %v240_v2  ;;  %v243_v5 = vld [vmem:[%s1303_s3] sm:$0x1]  ;;  %vm319_vm2 = vcmask 122880   ;;  %v323_v9 = vlaneseq  ;;  %v233_v13 = vld [vmem:[%s1155_s5 + $0x8] sm:$0xff] }
  0x51   : > { %v242_v6 = vld [vmem:[%s1302_s2] sm:$0x1]  ;;  %vm335_vm3 = vcmask 261120   ;;  %v234_v17 = vld [vmem:[%s1155_s5 + $0x10] sm:$0xff]  ;;  %v235_v18 = vld [vmem:[%s1155_s5 + $0x18] sm:$0xff]  ;;  %vm422_vm4 = vcmask 1041409  }
  0x52   : > { %809 = vmatpush3.bf16.msra.mxu0 %v808_v4  ;;  %v318_v7 = vmul.f32 %v243_v5, %v242_v6  ;;  %v1171_v10 = vshrl.u32 %v323_v9, 7  ;;  %v232_v14 = vld [vmem:[%s1155_s5] sm:$0xff]  ;;  %v237_v26 = vld [vmem:[%s1155_s5 + $0x28] sm:$0xff]  ;;  %v238_v31 = vld [vmem:[%s1155_s5 + $0x30] sm:$0xff]  ;;  %v389_v49 = vand.u32 127, %v323_v9  ;;  %vm424_vm5 = vcmask 1042434  }
  0x53   : > { %v236_v25 = vld [vmem:[%s1155_s5 + $0x20] sm:$0xff]  ;;  %v239_v32 = vld [vmem:[%s1155_s5 + $0x38] sm:$0xff]  ;;  %vm426_vm6 = vcmask 1043459   ;;  %vm428_vm7 = vcmask 1044484   ;;  %vm430_vm8 = vcmask 1045509   ;;  %vm432_vm9 = vcmask 1046534  }
  0x54   : > { %v320_v8 = vsel %vm319_vm2, %v318_v7, 0.0  ;;  %v1174_v11 = vsub.s32 0, %v1171_v10  ;;  %v1195_v54 = vsub.s32 %v389_v49, %v1171_v10  ;;  %vm434_vm10 = vcmask 1047559   ;;  %p228_p6 = scmp.lt.s32.totalorder %s1052_s19, 1 }
  0x55   : > { %805 = vmatmul.mubr.msk.f32.vlgmr.msra.gmra.mrb[0].mxu0 %vm244_vm1, %v243_v5  ;;  %321 = vadd.xlane.f32.xlu0 %v320_v8  ;;  %vm437_vm11 = vcmask 64512  }
  0x56   : > { %s1321_s19 = smov (!%p228_p6, %s1052_s19), 1 }
  0x57   : > { %s792_s24 = sshll.u32 %s1321_s19, 3 }
  0x58   : > { %s231_s18 = scalar_lea.vmem %s1304_s4, %s792_s24 }
  0xe2   : > { %v322_v39 = vpop.xlane.xlu0 %321 }
  0xe3   : > { %v363_v40 = vrot.slane %v322_v39, %v1174_v11 }
 0x128   : > { %v314_v12 = vpop.f32.mrb[0].mxu0 }
 0x129   : > { %v326_v15 = vrot.slane %v314_v12, %v1174_v11  ;;  %v806_v16 = vpop.f32.mrb[1].mxu0 }
 0x12b   : > { %v328_v19 = vmul.f32 %v326_v15, %v233_v13  ;;  %v327_v20 = vmul.f32 %v326_v15, %v232_v14  ;;  %v329_v23 = vmul.f32 %v326_v15, %v234_v17  ;;  %v330_v24 = vmul.f32 %v326_v15, %v235_v18 }
 0x12c   : > { %v331_v29 = vmul.f32 %v326_v15, %v236_v25  ;;  %v332_v30 = vmul.f32 %v326_v15, %v237_v26  ;;  %v333_v35 = vmul.f32 %v326_v15, %v238_v31  ;;  %v334_v36 = vmul.f32 %v326_v15, %v239_v32 }
 0x12d   : > { %v339_v21 = vsel %vm335_vm3, %v328_v19, 0.0  ;;  %v336_v22 = vsel %vm335_vm3, %v327_v20, 0.0  ;;  %v342_v27 = vsel %vm335_vm3, %v329_v23, 0.0  ;;  %v345_v28 = vsel %vm335_vm3, %v330_v24, 0.0 }
 0x12e   : > { %340 = vadd.xlane.f32.xlu1 %v339_v21  ;;  %337 = vadd.xlane.f32.xlu0 %v336_v22  ;;  %v348_v33 = vsel %vm335_vm3, %v331_v29, 0.0  ;;  %v351_v34 = vsel %vm335_vm3, %v332_v30, 0.0  ;;  %v354_v37 = vsel %vm335_vm3, %v333_v35, 0.0  ;;  %v357_v38 = vsel %vm335_vm3, %v334_v36, 0.0 }
 0x12f   : > { %v1007_v21 = vmov 0   ;;  %v448_v22 = vsub.s32 1, %v1171_v10  ;;  %v452_v23 = vsub.s32 2, %v1171_v10  ;;  %v456_v24 = vsub.s32 3, %v1171_v10 }
 0x130   : > { %867 = vset.pattern.permute.xlu1 %v1007_v21  ;;  %866 = vset.pattern.permute.xlu0 %v1007_v21  ;;  %v460_v31 = vsub.s32 4, %v1171_v10  ;;  %v464_v36 = vsub.s32 5, %v1171_v10 }
 0x132   : > { %343 = vadd.xlane.f32.xlu1 %v342_v27  ;;  %346 = vadd.xlane.f32.xlu0 %v345_v28 }
 0x136   : > { %349 = vadd.xlane.f32.xlu1 %v348_v33  ;;  %352 = vadd.xlane.f32.xlu0 %v351_v34 }
 0x13a   : > { %355 = vadd.xlane.f32.xlu1 %v354_v37  ;;  %358 = vadd.xlane.f32.xlu0 %v357_v38 }
 0x1bb   : > { %v341_v41 = vpop.xlane.xlu1 %340  ;;  %v338_v42 = vpop.xlane.xlu0 %337 }
 0x1bc   : > { %v365_v43 = vadd.f32 %v363_v40, %v341_v41  ;;  %v364_v44 = vadd.f32 %v363_v40, %v338_v42 }
 0x1be   : > { %868 = vtanh.f32 %v365_v43 }
 0x1bf   : > { %870 = vtanh.f32 %v364_v44  ;;  %v344_v45 = vpop.xlane.xlu1 %343  ;;  %v347_v46 = vpop.xlane.xlu0 %346  ;;  %v472_v44 = vsub.s32 7, %v1171_v10 }
 0x1c0   : > { %v366_v47 = vadd.f32 %v363_v40, %v344_v45  ;;  %v367_v48 = vadd.f32 %v363_v40, %v347_v46 }
 0x1c2   : > { %872 = vtanh.f32 %v366_v47 }
 0x1c3   : > { %874 = vtanh.f32 %v367_v48  ;;  %v350_v50 = vpop.xlane.xlu1 %349  ;;  %v353_v51 = vpop.xlane.xlu0 %352 }
 0x1c4   : > { %v368_v52 = vadd.f32 %v363_v40, %v350_v50  ;;  %v369_v53 = vadd.f32 %v363_v40, %v353_v51 }
 0x1c6   : > { %876 = vtanh.f32 %v368_v52 }
 0x1c7   : > { %878 = vtanh.f32 %v369_v53  ;;  %v356_v55 = vpop.xlane.xlu1 %355  ;;  %v359_v56 = vpop.xlane.xlu0 %358 }
 0x1c8   : > { %v869_v57 = vpop.eup %868  ;;  %v370_v58 = vadd.f32 %v363_v40, %v356_v55  ;;  %v371_v59 = vadd.f32 %v363_v40, %v359_v56  ;;  %v468_v40 = vsub.s32 6, %v1171_v10 }
 0x1c9   : > { %v871_v60 = vpop.eup %870  ;;  %v397_v61 = vrot.slane %v869_v57, %v1195_v54 }
 0x1ca   : > { %v393_v62 = vrot.slane %v871_v60, %v1195_v54  ;;  %880 = vtanh.f32 %v370_v58 }
 0x1cb   : > { %882 = vtanh.f32 %v371_v59 }
 0x1cc   : > { %v873_v63 = vpop.eup %872  ;;  %v423_v3 = vsel %vm422_vm4, %v397_v61, %v393_v62 }
 0x1cd   : > { %v875_v0 = vpop.eup %874  ;;  %v401_v1 = vrot.slane %v873_v63, %v1195_v54 }
 0x1ce   : > { %v405_v2 = vrot.slane %v875_v0, %v1195_v54 }
 0x1cf   : > { %v425_v4 = vsel %vm424_vm5, %v401_v1, %v423_v3 }
 0x1d0   : > { %v877_v5 = vpop.eup %876  ;;  %v427_v9 = vsel %vm426_vm6, %v405_v2, %v425_v4 }
 0x1d1   : > { %v879_v6 = vpop.eup %878  ;;  %v409_v7 = vrot.slane %v877_v5, %v1195_v54 }
 0x1d2   : > { %v413_v8 = vrot.slane %v879_v6, %v1195_v54 }
 0x1d3   : > { %v429_v12 = vsel %vm428_vm7, %v409_v7, %v427_v9 }
 0x1d4   : > { %v881_v13 = vpop.eup %880  ;;  %v431_v17 = vsel %vm430_vm8, %v413_v8, %v429_v12 }
 0x1d5   : > { %v883_v14 = vpop.eup %882  ;;  %v417_v15 = vrot.slane %v881_v13, %v1195_v54 }
 0x1d6   : > { %v421_v16 = vrot.slane %v883_v14, %v1195_v54 }
 0x1d7   : > { %v433_v18 = vsel %vm432_vm9, %v417_v15, %v431_v17 }
 0x1d8   : > { %v435_v19 = vsel %vm434_vm10, %v421_v16, %v433_v18 }
 0x1d9   : > { %v438_v20 = vsel %vm437_vm11, %v435_v19, -inf }
 0x1da   : > { %439 = vmax.xlane.f32.xlu1 %v438_v20 }
 0x267   : > { %v440_v25 = vpop.xlane.xlu1 %439 }
 0x268   : > { %v445_v26 = vrot.slane %v440_v25, %v1174_v11  ;;  %v449_v27 = vrot.slane %v440_v25, %v448_v22  ;;  %v453_v28 = vrot.slane %v440_v25, %v452_v23  ;;  %v457_v32 = vrot.slane %v440_v25, %v456_v24 }
 0x269   : > { %v461_v37 = vrot.slane %v440_v25, %v460_v31  ;;  %v465_v41 = vrot.slane %v440_v25, %v464_v36  ;;  %v469_v45 = vrot.slane %v440_v25, %v468_v40  ;;  %v473_v50 = vrot.slane %v440_v25, %v472_v44 }
 0x26a   : > { %v482_v29 = vsub.f32 %v871_v60, %v445_v26  ;;  %v483_v30 = vsub.f32 %v869_v57, %v449_v27  ;;  %v484_v33 = vsub.f32 %v873_v63, %v453_v28  ;;  %v485_v38 = vsub.f32 %v875_v0, %v457_v32 }
 0x26b   : > { %v486_v42 = vsub.f32 %v877_v5, %v461_v37  ;;  %v487_v46 = vsub.f32 %v879_v6, %v465_v41  ;;  %v488_v51 = vsub.f32 %v881_v13, %v469_v45  ;;  %v489_v55 = vsub.f32 %v883_v14, %v473_v50 }
 0x26c   : > { %v490_v34 = vmul.f32 1.442695, %v482_v29  ;;  %v492_v35 = vmul.f32 1.442695, %v483_v30  ;;  %v494_v39 = vmul.f32 1.442695, %v484_v33 }
 0x26d   : > { %v496_v43 = vmul.f32 1.442695, %v485_v38  ;;  %v498_v47 = vmul.f32 1.442695, %v486_v42  ;;  %v500_v52 = vmul.f32 1.442695, %v487_v46 }
 0x26e   : > { %884 = vpow2.f32 %v490_v34  ;;  %v502_v56 = vmul.f32 1.442695, %v488_v51  ;;  %v504_v58 = vmul.f32 1.442695, %v489_v55 }
 0x26f   : > { %886 = vpow2.f32 %v492_v35 }
 0x270   : > { %888 = vpow2.f32 %v494_v39 }
 0x271   : > { %890 = vpow2.f32 %v496_v43 }
 0x272   : > { %892 = vpow2.f32 %v498_v47 }
 0x273   : > { %894 = vpow2.f32 %v500_v52 }
 0x274   : > { %896 = vpow2.f32 %v502_v56 }
 0x275   : > { %898 = vpow2.f32 %v504_v58 }
 0x278   : > { %v885_v48 = vpop.eup %884 }
 0x279   : > { %v887_v49 = vpop.eup %886  ;;  %515 = vperm.xlu0 %866, %v885_v48  }
 0x27a   : > { %518 = vperm.xlu1 %867, %v887_v49   ;;  %v889_v53 = vpop.eup %888 }
 0x27b   : > { %v891_v57 = vpop.eup %890 }
 0x27c   : > { %v893_v59 = vpop.eup %892 }
 0x27d   : > { %v895_v60 = vpop.eup %894 }
 0x27e   : > { %521 = vperm.xlu1 %867, %v889_v53   ;;  %v897_v61 = vpop.eup %896 }
 0x27f   : > { %v899_v62 = vpop.eup %898 }
 0x282   : > { %524 = vperm.xlu1 %867, %v891_v57  }
 0x286   : > { %527 = vperm.xlu1 %867, %v893_v59  }
 0x28a   : > { %530 = vperm.xlu1 %867, %v895_v60  }
 0x28e   : > { %533 = vperm.xlu1 %867, %v897_v61  }
 0x292   : > { %536 = vperm.xlu1 %867, %v899_v62  }
 0x2f8   : > { %v516_v3 = vpop.permute.xlu0 %515 }
 0x2f9   : > { %v519_v63 = vpop.permute.xlu1 %518  ;;  %v541_v6 = vrot.slane %v516_v3, %v1195_v54 }
 0x2fa   : > { %v545_v5 = vrot.slane %v519_v63, %v1195_v54 }
 0x2fc   : > { %v570_v13 = vsel %vm422_vm4, %v545_v5, %v541_v6 }
 0x2fd   : > { %v522_v0 = vpop.permute.xlu1 %521 }
 0x2fe   : > { %v549_v7 = vrot.slane %v522_v0, %v1195_v54 }
 0x300   : > { %v571_v15 = vsel %vm424_vm5, %v549_v7, %v570_v13 }
 0x301   : > { %v525_v1 = vpop.permute.xlu1 %524 }
 0x302   : > { %v553_v8 = vrot.slane %v525_v1, %v1195_v54 }
 0x304   : > { %v572_v17 = vsel %vm426_vm6, %v553_v8, %v571_v15 }
 0x305   : > { %v528_v2 = vpop.permute.xlu1 %527 }
 0x306   : > { %v557_v9 = vrot.slane %v528_v2, %v1195_v54 }
 0x308   : > { %v573_v18 = vsel %vm428_vm7, %v557_v9, %v572_v17 }
 0x309   : > { %v531_v4 = vpop.permute.xlu1 %530 }
 0x30a   : > { %v561_v14 = vrot.slane %v531_v4, %v1195_v54 }
 0x30c   : > { %v574_v20 = vsel %vm430_vm8, %v561_v14, %v573_v18 }
 0x30d   : > { %v534_v12 = vpop.permute.xlu1 %533 }
 0x30e   : > { %v565_v16 = vrot.slane %v534_v12, %v1195_v54 }
 0x310   : > { %v575_v25 = vsel %vm432_vm9, %v565_v16, %v574_v20 }
 0x311   : > { %v537_v19 = vpop.permute.xlu1 %536 }
 0x312   : > { %v569_v21 = vrot.slane %v537_v19, %v1195_v54 }
 0x314   : > { %v576_v26 = vsel %vm434_vm10, %v569_v21, %v575_v25 }
 0x315   : > { %v578_v27 = vsel %vm437_vm11, %v576_v26, 0.0 }
 0x316   : > { %579 = vadd.xlane.f32.xlu1 %v578_v27 }
 0x3a3   : > { %v580_v28 = vpop.xlane.xlu1 %579 }
 0x3a4   : > { %900 = vrcp.f32 %v580_v28 }
 0x3ae   : > { %v901_v29 = vpop.eup %900 }
 0x3af   : > { %v582_v30 = vmul.f32 %v901_v29, %v580_v28 }
 0x3b1   : > { %v583_v32 = vsub.f32 2.0, %v582_v30 }
 0x3b3   : > { %v584_v33 = vmul.f32 %v901_v29, %v583_v32 }
 0x3b5   : > { %v589_v34 = vrot.slane %v584_v33, %v1174_v11  ;;  %v593_v37 = vrot.slane %v584_v33, %v448_v22  ;;  %v597_v39 = vrot.slane %v584_v33, %v452_v23  ;;  %v601_v42 = vrot.slane %v584_v33, %v456_v24 }
 0x3b6   : > { %v605_v45 = vrot.slane %v584_v33, %v460_v31  ;;  %v609_v22 = vrot.slane %v584_v33, %v464_v36  ;;  %v613_v23 = vrot.slane %v584_v33, %v468_v40  ;;  %v617_v24 = vrot.slane %v584_v33, %v472_v44 }
 0x3b7   : > { %v626_v35 = vmul.f32 %v885_v48, %v589_v34  ;;  %v627_v38 = vmul.f32 %v887_v49, %v593_v37  ;;  %v628_v41 = vmul.f32 %v889_v53, %v597_v39  ;;  %v629_v43 = vmul.f32 %v891_v57, %v601_v42 }
 0x3b8   : > { %v630_v11 = vmul.f32 %v893_v59, %v605_v45  ;;  %v631_v46 = vmul.f32 %v895_v60, %v609_v22  ;;  %v632_v47 = vmul.f32 %v897_v61, %v613_v23  ;;  %v633_v48 = vmul.f32 %v899_v62, %v617_v24 }
 0x3b9   : > { %643 = vperm.xlu0 %866, %v626_v35  }
 0x3bd   : > { %646 = vperm.xlu0 %866, %v627_v38  }
 0x3c1   : > { %649 = vperm.xlu0 %866, %v628_v41  }
 0x3c5   : > { %652 = vperm.xlu0 %866, %v629_v43  }
 0x3c9   : > { %655 = vperm.xlu0 %866, %v630_v11  }
 0x3cd   : > { %658 = vperm.xlu0 %866, %v631_v46  }
 0x3d1   : > { %661 = vperm.xlu0 %866, %v632_v47  }
 0x3d5   : > { %664 = vperm.xlu0 %866, %v633_v48  }
 0x438   : > { %v644_v31 = vpop.permute.xlu0 %643 }
 0x439   : > { %v669_v55 = vrot.slane %v644_v31, %v1195_v54 }
 0x43c   : > { %v647_v49 = vpop.permute.xlu0 %646 }
 0x43d   : > { %v673_v53 = vrot.slane %v647_v49, %v1195_v54 }
 0x43f   : > { %v698_v57 = vsel %vm422_vm4, %v673_v53, %v669_v55 }
 0x440   : > { %v650_v50 = vpop.permute.xlu0 %649 }
 0x441   : > { %v677_v40 = vrot.slane %v650_v50, %v1195_v54 }
 0x443   : > { %v699_v59 = vsel %vm424_vm5, %v677_v40, %v698_v57 }
 0x444   : > { %v653_v51 = vpop.permute.xlu0 %652 }
 0x445   : > { %v681_v10 = vrot.slane %v653_v51, %v1195_v54 }
 0x447   : > { %v700_v61 = vsel %vm426_vm6, %v681_v10, %v699_v59 }
 0x448   : > { %v656_v52 = vpop.permute.xlu0 %655 }
 0x449   : > { %v685_v44 = vrot.slane %v656_v52, %v1195_v54 }
 0x44b   : > { %v701_v62 = vsel %vm428_vm7, %v685_v44, %v700_v61 }
 0x44c   : > { %v659_v36 = vpop.permute.xlu0 %658 }
 0x44d   : > { %v689_v58 = vrot.slane %v659_v36, %v1195_v54 }
 0x44f   : > { %v702_v0 = vsel %vm430_vm8, %v689_v58, %v701_v62 }
 0x450   : > { %v662_v56 = vpop.permute.xlu0 %661 }
 0x451   : > { %v693_v60 = vrot.slane %v662_v56, %v1195_v54 }
 0x453   : > { %v703_v2 = vsel %vm432_vm9, %v693_v60, %v702_v0 }
 0x454   : > { %v665_v63 = vpop.permute.xlu0 %664 }
 0x455   : > { %v697_v1 = vrot.slane %v665_v63, %v1195_v54 }
 0x457   : > { %v704_v3 = vsel %vm434_vm10, %v697_v1, %v703_v2 }
 0x458   : > { %706 = vst.msk [vmem:[%s231_s18] sm:$0xff] %vm437_vm11, %v704_v3 }
 0x459 PF: > { %p15_p1 = scmp.ge.s32.totalorder %s1077_s25, 4   ;;  %s1316_s15 = smov %s990_s16 }
 0x45a   : > { %s1317_s16 = smov %s994_s17  ;;  %s1318_s17 = smov %s1106_s14 }
 0x45b   : > { %s1319_s18 = smov %s1077_s25  ;;  %17 = sbr.rel (!%p15_p1) target bundleno = 4 (0x4), region = 80 }
 0x462   :  { %726 = vsyncpa [#allocation3], 1 }
 0x463   :  { %728 = vsyncpa [#allocation3 + $0x1], 1 }
 0x464   :  { %729 = vsyncpa [#allocation5], 1 }

</bundles_post_ra>
